<compile_context>
chip_gen: v5e
topology: v5e:2x2
jax: 0.10.0
libtpu: 0.0.40
codegen_flags: <defaults>
</compile_context>

<pallas_src>
import functools

import jax
import jax.numpy as jnp
from jax.experimental import pallas as pl
from jax.experimental.pallas import tpu as pltpu

_LANE = 128


def _device_kind() -> str:
    try:
        return jax.devices()[0].device_kind.lower()
    except Exception:
        return ""


def _default_block_bytes() -> int:
    kind = _device_kind()
    # v7x: a 4 MiB block's read+write round trip is only ~2.5 us at ~3.2 TB/s,
    # so the ~0.35 us/step overhead is 12-15% of wall; 8 MiB blocks cut that to
    # ~6% and keep in+out double-buffering at 4*8 = 32 MiB (< 48 MiB limit).
    if "v7" in kind or "tpu7" in kind:
        return 8 << 20
    # v5e/v6e already sit at the ~85% HBM-roofline plateau with 4 MiB blocks.
    return 4 << 20


def _compute_dtype(dtype):
    dtype = jnp.dtype(dtype)
    if dtype == jnp.bfloat16:
        kind = _device_kind()
        # bf16 VALU exists on v6e/v7x; keep bf16 there, upcast on v5 and older.
        if not any(v in kind for v in ("v2", "v3", "v4", "v5")):
            return jnp.bfloat16
        return jnp.float32
    if dtype.itemsize < 4:
        return jnp.float32  # fp16 / fp8 / int8 / int16: widen for the chain
    return dtype


def _pow_by_squaring(base, n):
    """base**n for a static Python int n >= 1 via square-and-multiply."""
    result = None
    while n > 0:
        if n & 1:
            result = base if result is None else result * base
        n >>= 1
        if n:
            base = base * base
    return result


def _reluk_kernel(x_ref, o_ref, *, k, compute_dtype):
    x = x_ref[...].astype(compute_dtype)
    r = jnp.maximum(x, jnp.zeros_like(x))
    if k == 0:
        # torch.pow semantics: x**0 == 1 everywhere (including relu(x) == 0).
        y = jnp.ones_like(r)
    else:
        y = _pow_by_squaring(r, abs(k))
        if k < 0:
            y = jnp.ones_like(y) / y  # inf where relu(x) == 0, as in torch
    o_ref[...] = y.astype(o_ref.dtype)


def relu_k(x, k=1, *, target_block_bytes=None):
    """Applies relu(x)**k elementwise to an any-shape (e.g. NCHW) array."""
    orig_shape = x.shape
    dtype = x.dtype
    total = x.size
    if total == 0:
        return x
    if target_block_bytes is None:
        target_block_bytes = _default_block_bytes()

    dtype_bytes = jnp.dtype(dtype).itemsize
    kernel = functools.partial(
        _reluk_kernel, k=k, compute_dtype=_compute_dtype(dtype))
    cost = pl.CostEstimate(
        flops=2 * max(abs(k), 1) * total,
        transcendentals=0,
        bytes_accessed=2 * total * dtype_bytes,
    )
    # TODO(synk): on v7x, verify in a profile that both TensorCores stream;
    # if only one TC is active, switch this axis to pltpu.CORE_PARALLEL.
    cparams = pltpu.CompilerParams(
        dimension_semantics=("parallel",),
        vmem_limit_bytes=48 << 20,
    )

    x_flat = jnp.ravel(x)  # metadata-only reshape, no extra HBM pass

    if total % _LANE == 0:
        # Lane-dense 2D slab: widest C (multiple of 128) dividing the flat
        # length -> wide unmasked vector stores and a short grid.
        C = _LANE
        for cand in (8192, 4096, 2048, 1024, 512, 256):
            if total % cand == 0:
                C = cand
                break
        rows = total // C
        target_rows = max(1, (target_block_bytes // dtype_bytes) // C)
        if target_rows >= rows:
            tile_rows = rows  # single full-extent block (always legal)
        else:
            # Balanced tiling: near-equal blocks, multiple of 32 sublanes so
            # the same path is legal for f32 / bf16 / int8 packing.
            n_blocks = pl.cdiv(rows, target_rows)
            tile_rows = pl.cdiv(pl.cdiv(rows, n_blocks), 32) * 32
            tile_rows = min(tile_rows, rows)
        grid = (pl.cdiv(rows, tile_rows),)
        shape2d = (rows, C)
        block = (tile_rows, C)
        index_map = lambda i: (i, 0)
    else:
        # Misaligned total: (1, N) slab blocked along lanes; the ragged final
        # block is masked by Pallas -> no jnp.pad / slice HBM passes.
        # TODO(synk): this fallback is correct but not lane-dense-optimal for
        # very large misaligned inputs; typical NCHW activations take the
        # aligned path above.
        tile = max(_LANE, (target_block_bytes // dtype_bytes) // _LANE * _LANE)
        if tile >= total:
            tile = total  # full-extent block (legal for any length)
        grid = (pl.cdiv(total, tile),)
        shape2d = (1, total)
        block = (1, tile)
        index_map = lambda i: (0, i)

    out2d = pl.pallas_call(
        kernel,
        out_shape=jax.ShapeDtypeStruct(shape2d, dtype),
        grid_spec=pltpu.PrefetchScalarGridSpec(
            num_scalar_prefetch=0,
            grid=grid,
            in_specs=[pl.BlockSpec(block, index_map)],
            out_specs=pl.BlockSpec(block, index_map),
        ),
        compiler_params=cparams,
        cost_estimate=cost,
    )(x_flat.reshape(shape2d))

    return out2d.reshape(orig_shape)


if __name__ == "__main__":
    key = jax.random.PRNGKey(0)
    k1, k2, k3, k4 = jax.random.split(key, 4)

    # 1) NCHW f32, aligned lane-dense path, k=2 (matches the PyTorch module).
    x = jax.random.normal(k1, (2, 4, 16, 16), dtype=jnp.float32)
    y = jax.block_until_ready(relu_k(x, k=2))
    ref = jnp.maximum(jnp.zeros_like(x), x) ** 2
    assert y.shape == x.shape and y.dtype == x.dtype
    assert jnp.allclose(y, ref, atol=1e-6), "f32 aligned mismatch"

    # 2) bf16 input, k=3 (bf16-native compute on v6e/v7x, f32 on v5e).
    xb = jax.random.normal(k2, (2, 4, 16, 16), dtype=jnp.bfloat16)
    yb = jax.block_until_ready(relu_k(xb, k=3))
    refb = jnp.maximum(jnp.zeros_like(xb), xb) ** 3
    assert yb.dtype == xb.dtype
    assert jnp.allclose(yb.astype(jnp.float32), refb.astype(jnp.float32),
                        rtol=5e-2, atol=1e-3), "bf16 mismatch"

    # 3) Misaligned total (7*19 = 133 elements): single full-extent block,
    #    no pad/slice copies.
    xo = jax.random.normal(k3, (7, 19), dtype=jnp.float32)
    yo = jax.block_until_ready(relu_k(xo, k=2))
    refo = jnp.maximum(jnp.zeros_like(xo), xo) ** 2
    assert jnp.allclose(yo, refo, atol=1e-6), "misaligned mismatch"

    # 4) Misaligned total with a forced ragged (masked) final block
    #    (1500 elements, 512-element blocks -> 3 grid steps, last masked).
    xr = jax.random.normal(k4, (5, 300), dtype=jnp.float32)
    yr = jax.block_until_ready(relu_k(xr, k=2, target_block_bytes=2048))
    refr = jnp.maximum(jnp.zeros_like(xr), xr) ** 2
    assert jnp.allclose(yr, refr, atol=1e-6), "ragged-block mismatch"

    print("KERNEL_OK")
</pallas_src>

<mosaic_0001>
module attributes {stable_mosaic.version = 11 : i64} {
  func.func @_reluk_kernel(%arg0: i32, %arg1: memref<1x2048xf32, #tpu.memory_space<vmem>>, %arg2: memref<1x2048xf32, #tpu.memory_space<vmem>>) attributes {dimension_semantics = [#tpu.dimension_semantics<parallel>], iteration_bounds = array<i64: 1>, scalar_prefetch = 0 : i64, scratch_operands = 0 : i64, tpu.core_type = #tpu.core_type<tc>, window_params = [{transform_indices = @transform_0, window_bounds = array<i64: 1, 2048>}, {transform_indices = @transform_1, window_bounds = array<i64: 1, 2048>}]} {
    %c0 = arith.constant 0 : index
    %c0_0 = arith.constant 0 : index
    %0 = vector.load %arg1[%c0, %c0_0] : memref<1x2048xf32, #tpu.memory_space<vmem>>, vector<1x2048xf32>
    %cst = arith.constant 0.000000e+00 : f32
    %1 = vector.broadcast %cst : f32 to vector<1x2048xf32>
    %2 = arith.maximumf %0, %1 : vector<1x2048xf32>
    %3 = arith.mulf %2, %2 : vector<1x2048xf32>
    %c0_1 = arith.constant 0 : index
    %c0_2 = arith.constant 0 : index
    %4 = vector.load %arg2[%c0_1, %c0_2] : memref<1x2048xf32, #tpu.memory_space<vmem>>, vector<1x2048xf32>
    tpu.vector_store %arg2[%c0_1, %c0_2], %3 {strides = array<i32>} : memref<1x2048xf32, #tpu.memory_space<vmem>>, vector<1x2048xf32>,
    return
  }
  func.func @transform_0(%arg0: i32) -> (i32, i32) {
    %c0_i32 = arith.constant 0 : i32
    %c0_i32_0 = arith.constant 0 : i32
    return %arg0, %c0_i32 : i32, i32
  }
  func.func @transform_1(%arg0: i32) -> (i32, i32) {
    %c0_i32 = arith.constant 0 : i32
    %c0_i32_0 = arith.constant 0 : i32
    return %arg0, %c0_i32 : i32, i32
  }
}

</mosaic_0001>

<bundles_post_ra>
// kernel: tpu_custom_call.1
= control target key start
LH: loop header
LB: loop body
LE: loop exit
PB: predicated region body
PF: predicated region fallthrough
CT: control target
= control target key end

     0   :  { %6 = vsyncpa [#allocation3], 0  ;;  %s120_s0 = inlined_call_operand.hbm [shape: f32[1,2048], index: 0, kind: input, shape index: {}]   ;;  %s121_s1 = inlined_call_operand.hbm [shape: f32[1,2048], index: 1, kind: output, shape index: {}]  }
   0x1   :  { %7 = vsyncpa [#allocation4], 0  ;;  %s13_s8 = sshll.u32 %s120_s0, 4  ;;  %s102_s9 = smov [#allocation2]   ;;  %s14_s8 = int_to_ptr.hbm [resolvable:$true] %s13_s8 }
   0x2   :  { %s15_s10 = sshll.u32 %s102_s9, 4  ;;  %s16_s10 = int_to_ptr.vmem [resolvable:$true] %s15_s10 }
   0x3   :  { %18 = dma.hbm_to_vmem [thread:$0]  %s14_s8, 256, %s16_s10, [#allocation3]  }
   0x4   :  { %98 = dma.done.wait [#allocation3], 256  }
   0x5   :  { %99 = vsyncadd [#allocation3], 4294967040  ;;  %v23_v0 = vld [vmem:[#allocation2] sm:$0xff]  ;;  %v24_v1 = vld [vmem:[#allocation2 + $0x8] sm:$0xff]  ;;  %s103_s11 = smov [#allocation5]   ;;  %s38_s15 = sshll.u32 %s121_s1, 4  ;;  %s39_s15 = int_to_ptr.hbm [resolvable:$true] %s38_s15 }
   0x6   :  { %v25_v2 = vmax.f32 %v23_v0, 0.0  ;;  %v26_v3 = vmax.f32 %v24_v1, 0.0  ;;  %s36_s12 = sshll.u32 %s103_s11, 4  ;;  %s37_s12 = int_to_ptr.vmem [resolvable:$true] %s36_s12 }
   0x8   :  { %v27_v4 = vmul.f32 %v25_v2, %v25_v2  ;;  %v28_v5 = vmul.f32 %v26_v3, %v26_v3 }
   0xa   :  { %29 = vst [vmem:[#allocation5] sm:$0xff] %v27_v4 }
   0xb   :  { %30 = vst [vmem:[#allocation5 + $0x8] sm:$0xff] %v28_v5 }
   0xc   :  { %41 = dma.vmem_to_hbm [thread:$0]  %s37_s12, 256, %s39_s15, [#allocation4]  }
   0xd   :  { %100 = dma.done.wait [#allocation4], 256  }
   0xe   :  { %101 = vsyncadd [#allocation4], 4294967040 }
   0xf   :  { %46 = vsyncpa [#allocation3], 1 }
  0x10   :  { %47 = vsyncpa [#allocation4], 1 }

</bundles_post_ra>
